<compile_context>
chip_gen: v5e
topology: v5e:2x2
jax: 0.10.0
libtpu: 0.0.40
codegen_flags: <defaults>
</compile_context>

<pallas_src>
import jax
import jax.numpy as jnp
from jax.experimental import pallas as pl
from jax.experimental.pallas import tpu as pltpu


# ----------------------------- fused Pallas kernel ------------------------------

def _make_fused_kernel(N, S, skip_head):
    """Build the fused kernel body for a static skip_head flag.

    Inputs (all whole-array VMEM refs):
      p_ref : (N*S, K)    bf16  im2col patches
      cw_ref: (K, Cpad)   bf16  conv weight (zero-padded channels)
      cb_ref: (1, Cpad)   f32   conv bias   (zero-padded)
      [lw_ref: (Cpad, Cpad) bf16, lb_ref: (1, Cpad) f32]   only when skip_head=False
      o_ref : (N, Cpad)   f32   padded output (logits or normalized features)
    """
    inv_s = 1.0 / float(S)

    def pooled_feats(p_ref, cw_ref, cb_ref):
        # conv as a single 2-D bf16 matmul on the MXU, f32 accumulate
        z = jnp.dot(p_ref[...], cw_ref[...], preferred_element_type=jnp.float32)
        z = jnp.maximum(z + cb_ref[...], 0.0)                  # bias + ReLU (f32, VPU)
        # global average pool: per-image sublane reduce, then a single scalar 1/S mul
        rows = [jnp.sum(z[n * S:(n + 1) * S, :], axis=0, keepdims=True)
                for n in range(N)]
        return jnp.concatenate(rows, axis=0) * inv_s           # (N, Cpad) f32

    if skip_head:
        def kernel(p_ref, cw_ref, cb_ref, o_ref):
            feats = pooled_feats(p_ref, cw_ref, cb_ref)
            # F.normalize(x, p=2, dim=1): padded channels are exactly 0, so they
            # contribute nothing to the norm.  rsqrt(max(ss, 1e-24)) == 1/max(||x||,1e-12).
            ss = jnp.sum(feats * feats, axis=1, keepdims=True)
            o_ref[...] = feats * jax.lax.rsqrt(jnp.maximum(ss, 1e-24))
    else:
        def kernel(p_ref, cw_ref, cb_ref, lw_ref, lb_ref, o_ref):
            feats = pooled_feats(p_ref, cw_ref, cb_ref)
            o_ref[...] = (jnp.dot(feats.astype(jnp.bfloat16), lw_ref[...],
                                  preferred_element_type=jnp.float32)
                          + lb_ref[...])
    return kernel


def _fused_forward(patches, params, N, S, skip_head):
    K = patches.shape[1]
    c_pad = params["conv_w"].shape[1]

    if skip_head:
        ins = (patches, params["conv_w"], params["conv_b"])
    else:
        ins = (patches, params["conv_w"], params["conv_b"],
               params["lin_w"], params["lin_b"])

    flops = 2 * N * S * K * c_pad + (0 if skip_head else 2 * N * c_pad * c_pad)
    bytes_accessed = sum(int(a.size) * a.dtype.itemsize for a in ins) + N * c_pad * 4

    vmem = pl.BlockSpec(memory_space=pltpu.MemorySpace.VMEM)
    return pl.pallas_call(
        _make_fused_kernel(N, S, skip_head),
        out_shape=jax.ShapeDtypeStruct((N, c_pad), jnp.float32),
        in_specs=[vmem] * len(ins),
        out_specs=vmem,
        cost_estimate=pl.CostEstimate(
            flops=flops,
            transcendentals=N if skip_head else 0,
            bytes_accessed=bytes_accessed),
    )(*ins)


# ------------------------------ wrappers -----------------------------------

def _im2col(x_nchw, kh=3, kw=3, pad=1):
    # layout glue: NCHW -> (N*H*W, KH*KW*Cin) patches, feature order = (kh, kw, cin)
    N, C, H, W = x_nchw.shape
    x = jnp.transpose(x_nchw, (0, 2, 3, 1))                      # NHWC
    x = jnp.pad(x, ((0, 0), (pad, pad), (pad, pad), (0, 0)))
    cols = [x[:, i:i + H, j:j + W, :] for i in range(kh) for j in range(kw)]
    patches = jnp.stack(cols, axis=3)                            # (N, H, W, kh*kw, C)
    return patches.reshape(N * H * W, kh * kw * C)


def head_switch_forward(x_nchw, params, skip_head=False):
    # Mirrors HeadSwitch.forward: body -> (tuple unwrap is a no-op here) -> head or norm.
    N, _, H, W = x_nchw.shape
    S = H * W
    patches = _im2col(x_nchw).astype(jnp.bfloat16)               # (N*S, K) bf16
    out_pad = _fused_forward(patches, params, N, S, skip_head)   # (N, 128) lane-dense
    n_out = params["n_feats"] if skip_head else params["n_classes"]
    return out_pad[:, :n_out]


# ------------------------------ pure-JAX reference ---------------------------

def _reference_forward(x_nchw, conv_w, conv_b, lin_w, lin_b, skip_head):
    N, _, H, W = x_nchw.shape
    p = _im2col(x_nchw)                                          # f32 patches
    z = jnp.maximum(p @ conv_w.reshape(-1, conv_w.shape[-1]) + conv_b, 0.0)
    feats = z.reshape(N, H * W, -1).mean(axis=1)
    if skip_head:
        nrm = jnp.sqrt(jnp.sum(feats * feats, axis=1, keepdims=True))
        return feats / jnp.maximum(nrm, 1e-12)
    return feats @ lin_w + lin_b


# -------------------------------- main --------------------------------------

if __name__ == "__main__":
    key = jax.random.PRNGKey(0)
    k_x, k_wc, k_bc, k_wl, k_bl = jax.random.split(key, 5)

    N, CIN, H, W = 2, 4, 16, 16
    COUT, NCLS, PAD = 32, 10, 128
    K = 3 * 3 * CIN

    x = jax.random.normal(k_x, (N, CIN, H, W), dtype=jnp.float32)

    # deterministic synthetic parameters (conv weight in (kh, kw, cin, cout) order to
    # match the im2col feature ordering; equivalent to torch's (cout, cin, kh, kw))
    conv_w = 0.1 * jax.random.normal(k_wc, (3, 3, CIN, COUT), dtype=jnp.float32)
    conv_b = 0.1 * jax.random.normal(k_bc, (COUT,), dtype=jnp.float32)
    lin_w = 0.1 * jax.random.normal(k_wl, (COUT, NCLS), dtype=jnp.float32)
    lin_b = 0.1 * jax.random.normal(k_bl, (NCLS,), dtype=jnp.float32)

    # kernel-facing params: lane dimension padded to 128, matmul operands in bf16
    params = dict(
        conv_w=jnp.zeros((K, PAD), jnp.float32)
               .at[:, :COUT].set(conv_w.reshape(K, COUT)).astype(jnp.bfloat16),
        conv_b=jnp.zeros((1, PAD), jnp.float32).at[0, :COUT].set(conv_b),
        lin_w=jnp.zeros((PAD, PAD), jnp.float32)
              .at[:COUT, :NCLS].set(lin_w).astype(jnp.bfloat16),
        lin_b=jnp.zeros((1, PAD), jnp.float32).at[0, :NCLS].set(lin_b),
        n_feats=COUT, n_classes=NCLS,
    )

    y_head = head_switch_forward(x, params, skip_head=False)    # (N, 10) logits
    y_norm = head_switch_forward(x, params, skip_head=True)     # (N, 32) L2-normalized
    jax.block_until_ready((y_head, y_norm))

    assert y_head.shape == (N, NCLS)
    assert y_norm.shape == (N, COUT)

    # loose tolerance: bf16 MXU operands vs f32 reference
    ref_head = _reference_forward(x, conv_w, conv_b, lin_w, lin_b, False)
    ref_norm = _reference_forward(x, conv_w, conv_b, lin_w, lin_b, True)
    assert jnp.allclose(y_head, ref_head, atol=2e-2, rtol=2e-2)
    assert jnp.allclose(y_norm, ref_norm, atol=2e-2, rtol=2e-2)

    print("KERNEL_OK")
</pallas_src>

<mosaic_0001>
module attributes {stable_mosaic.version = 11 : i64} {
  func.func @kernel(%arg0: memref<512x36xbf16, #tpu.memory_space<vmem>>, %arg1: memref<36x128xbf16, #tpu.memory_space<vmem>>, %arg2: memref<1x128xf32, #tpu.memory_space<vmem>>, %arg3: memref<128x128xbf16, #tpu.memory_space<vmem>>, %arg4: memref<1x128xf32, #tpu.memory_space<vmem>>, %arg5: memref<2x128xf32, #tpu.memory_space<vmem>>) attributes {dimension_semantics = [], scalar_prefetch = 0 : i64, scratch_operands = 0 : i64, tpu.core_type = #tpu.core_type<tc>} {
    %c0 = arith.constant 0 : index
    %c0_0 = arith.constant 0 : index
    %0 = vector.load %arg0[%c0, %c0_0] : memref<512x36xbf16, #tpu.memory_space<vmem>>, vector<512x36xbf16>
    %c0_1 = arith.constant 0 : index
    %c0_2 = arith.constant 0 : index
    %1 = vector.load %arg1[%c0_1, %c0_2] : memref<36x128xbf16, #tpu.memory_space<vmem>>, vector<36x128xbf16>
    %cst = arith.constant dense<0.000000e+00> : vector<512x128xf32>
    %2 = tpu.matmul %0, %1, %cst {dimension_numbers = #tpu.dot_dimension_numbers<[1], [0], [0], [1], [0, 0, 1, 1], [], []>} : vector<512x36xbf16>, vector<36x128xbf16>, vector<512x128xf32> -> vector<512x128xf32>
    %c0_3 = arith.constant 0 : index
    %c0_4 = arith.constant 0 : index
    %3 = vector.load %arg2[%c0_3, %c0_4] : memref<1x128xf32, #tpu.memory_space<vmem>>, vector<1x128xf32>
    %4 = vector.broadcast %3 : vector<1x128xf32> to vector<512x128xf32>
    %5 = arith.addf %2, %4 : vector<512x128xf32>
    %cst_5 = arith.constant 0.000000e+00 : f32
    %6 = vector.broadcast %cst_5 : f32 to vector<512x128xf32>
    %7 = arith.maximumf %5, %6 : vector<512x128xf32>
    %8 = vector.extract_strided_slice %7 {offsets = [0, 0], sizes = [256, 128], strides = [1, 1]} : vector<512x128xf32> to vector<256x128xf32>
    %cst_6 = arith.constant dense<0.000000e+00> : vector<128xf32>
    %9 = vector.multi_reduction <add>, %8, %cst_6 [0] : vector<256x128xf32> to vector<128xf32>
    %10 = vector.shape_cast %9 : vector<128xf32> to vector<1x128xf32>
    %11 = vector.extract_strided_slice %7 {offsets = [256, 0], sizes = [256, 128], strides = [1, 1]} : vector<512x128xf32> to vector<256x128xf32>
    %cst_7 = arith.constant dense<0.000000e+00> : vector<128xf32>
    %12 = vector.multi_reduction <add>, %11, %cst_7 [0] : vector<256x128xf32> to vector<128xf32>
    %13 = vector.shape_cast %12 : vector<128xf32> to vector<1x128xf32>
    %14 = tpu.concatenate %10, %13 in 0 : vector<1x128xf32>, vector<1x128xf32> -> vector<2x128xf32>
    %cst_8 = arith.constant 3.906250e-03 : f32
    %15 = vector.broadcast %cst_8 : f32 to vector<2x128xf32>
    %16 = arith.mulf %14, %15 : vector<2x128xf32>
    %17 = arith.truncf %16 : vector<2x128xf32> to vector<2x128xbf16>
    %c0_9 = arith.constant 0 : index
    %c0_10 = arith.constant 0 : index
    %18 = vector.load %arg3[%c0_9, %c0_10] : memref<128x128xbf16, #tpu.memory_space<vmem>>, vector<128x128xbf16>
    %cst_11 = arith.constant dense<0.000000e+00> : vector<2x128xf32>
    %19 = tpu.matmul %17, %18, %cst_11 {dimension_numbers = #tpu.dot_dimension_numbers<[1], [0], [0], [1], [0, 0, 1, 1], [], []>} : vector<2x128xbf16>, vector<128x128xbf16>, vector<2x128xf32> -> vector<2x128xf32>
    %c0_12 = arith.constant 0 : index
    %c0_13 = arith.constant 0 : index
    %20 = vector.load %arg4[%c0_12, %c0_13] : memref<1x128xf32, #tpu.memory_space<vmem>>, vector<1x128xf32>
    %21 = vector.broadcast %20 : vector<1x128xf32> to vector<2x128xf32>
    %22 = arith.addf %19, %21 : vector<2x128xf32>
    %c0_14 = arith.constant 0 : index
    %c0_15 = arith.constant 0 : index
    %23 = vector.load %arg5[%c0_14, %c0_15] : memref<2x128xf32, #tpu.memory_space<vmem>>, vector<2x128xf32>
    tpu.vector_store %arg5[%c0_14, %c0_15], %22 {strides = array<i32>} : memref<2x128xf32, #tpu.memory_space<vmem>>, vector<2x128xf32>,
    return
  }
}

</mosaic_0001>

<bundles_post_ra>
// kernel: tpu_custom_call.1
= control target key start
LH: loop header
LB: loop body
LE: loop exit
PB: predicated region body
PF: predicated region fallthrough
CT: control target
= control target key end

     0   :  { %vm367_vm0 = vcmask 1041408   ;;  %s1408_s0 = inlined_call_operand.vmem [shape: bf16[512,36], index: 0, kind: input, shape index: {}]   ;;  %s1409_s1 = inlined_call_operand.vmem [shape: bf16[36,128], index: 1, kind: input, shape index: {}]   ;;  %s1410_s2 = inlined_call_operand.vmem [shape: f32[1,128], index: 2, kind: input, shape index: {}]   ;;  %s1411_s3 = inlined_call_operand.vmem [shape: bf16[128,128], index: 3, kind: input, shape index: {}]   ;;  %s1412_s4 = inlined_call_operand.vmem [shape: f32[1,128], index: 4, kind: input, shape index: {}]   ;;  %s1413_s5 = inlined_call_operand.hbm [shape: f32[2,128], index: 5, kind: output, shape index: {}]  }
   0x1   :  { %v90_v0 = vld [vmem:[%s1409_s1 + $0x10] sm:$0x3] }
   0x2   :  { %v264_v1 = vunpack.c.l.b16 %v90_v0 }
   0x4   :  { %v267_v2 = vpack.c.b16 %v264_v1, %v264_v1 }
   0x5   :  { %10 = vsyncpa [#allocation3], 0  ;;  %v1013_v4 = vld [vmem:[%s1409_s1 + $0x8] sm:$0xff]  ;;  %v1012_v5 = vld [vmem:[%s1409_s1] sm:$0xff]  ;;  %vm270_vm1 = vcmask 293888   ;;  %vm678_vm2 = vcmask 1040384  }
   0x6   :  { %v369_v3 = vsel %vm367_vm0, %v267_v2, 0  ;;  %v980_v6 = vld [vmem:[%s1408_s0] sm:$0xff]  ;;  %v994_v7 = vld [vmem:[%s1408_s0 + $0x70] sm:$0xff]  ;;  %v1003_v8 = vld [vmem:[%s1408_s0 + $0xb8] sm:$0xff]  ;;  %s1060_s27 = smov [#allocation2]   ;;  %s771_s30 = sshll.u32 %s1413_s5, 4  ;;  %s772_s30 = int_to_ptr.hbm [resolvable:$true] %s771_s30 }
   0x7   :  { %376 = vmatpush.bf16.msra.mxu0 %v369_v3  ;;  %1023 = vmatpush.bf16.msra.mxu2 %v369_v3  ;;  %v981_v9 = vld [vmem:[%s1408_s0 + $0x8] sm:$0xff]  ;;  %v995_v10 = vld [vmem:[%s1408_s0 + $0x78] sm:$0xff]  ;;  %v1004_v11 = vld [vmem:[%s1408_s0 + $0xc0] sm:$0xff]  ;;  %s769_s28 = sshll.u32 %s1060_s27, 4  ;;  %s770_s28 = int_to_ptr.vmem [resolvable:$true] %s769_s28 }
   0x8   :  { %1024 = vmatpush.bf16.msra.mxu3 %v369_v3  ;;  %1022 = vmatpush.bf16.msra.mxu1 %v369_v3  ;;  %v982_v12 = vld [vmem:[%s1408_s0 + $0x10] sm:$0xff]  ;;  %v996_v13 = vld [vmem:[%s1408_s0 + $0x80] sm:$0xff]  ;;  %v1005_v14 = vld [vmem:[%s1408_s0 + $0xc8] sm:$0xff] }
   0x9   :  { %v983_v15 = vld [vmem:[%s1408_s0 + $0x18] sm:$0xff]  ;;  %v997_v16 = vld [vmem:[%s1408_s0 + $0x88] sm:$0xff]  ;;  %v1006_v17 = vld [vmem:[%s1408_s0 + $0xd0] sm:$0xff] }
   0xa   :  { %v989_v18 = vld [vmem:[%s1408_s0 + $0x48] sm:$0xff]  ;;  %v984_v19 = vld [vmem:[%s1408_s0 + $0x20] sm:$0xff]  ;;  %v998_v20 = vld [vmem:[%s1408_s0 + $0x90] sm:$0xff] }
   0xb   :  { %377 = vmatpush.bf16.msra.mxu0 %v1013_v4  ;;  %1026 = vmatpush.bf16.msra.mxu2 %v1013_v4  ;;  %v1007_v21 = vld [vmem:[%s1408_s0 + $0xd8] sm:$0xff]  ;;  %v990_v22 = vld [vmem:[%s1408_s0 + $0x50] sm:$0xff]  ;;  %v985_v23 = vld [vmem:[%s1408_s0 + $0x28] sm:$0xff] }
   0xc   :  { %1027 = vmatpush.bf16.msra.mxu3 %v1013_v4  ;;  %1025 = vmatpush.bf16.msra.mxu1 %v1013_v4  ;;  %v999_v24 = vld [vmem:[%s1408_s0 + $0x98] sm:$0xff]  ;;  %v1008_v25 = vld [vmem:[%s1408_s0 + $0xe0] sm:$0xff]  ;;  %v986_v27 = vld [vmem:[%s1408_s0 + $0x30] sm:$0xff] }
   0xd   :  { %v991_v26 = vld [vmem:[%s1408_s0 + $0x58] sm:$0xff]  ;;  %v1000_v28 = vld [vmem:[%s1408_s0 + $0xa0] sm:$0xff]  ;;  %v1009_v29 = vld [vmem:[%s1408_s0 + $0xe8] sm:$0xff] }
   0xe   :  { %v992_v30 = vld [vmem:[%s1408_s0 + $0x60] sm:$0xff]  ;;  %v987_v31 = vld [vmem:[%s1408_s0 + $0x38] sm:$0xff]  ;;  %v1001_v32 = vld [vmem:[%s1408_s0 + $0xa8] sm:$0xff] }
   0xf   :  { %378 = vmatpush.bf16.msra.mxu0 %v1012_v5  ;;  %1029 = vmatpush.bf16.msra.mxu2 %v1012_v5  ;;  %v1010_v33 = vld [vmem:[%s1408_s0 + $0xf0] sm:$0xff]  ;;  %v993_v34 = vld [vmem:[%s1408_s0 + $0x68] sm:$0xff]  ;;  %v988_v35 = vld [vmem:[%s1408_s0 + $0x40] sm:$0xff] }
  0x10   :  { %1030 = vmatpush.bf16.msra.mxu3 %v1012_v5  ;;  %1028 = vmatpush.bf16.msra.mxu1 %v1012_v5  ;;  %v1002_v36 = vld [vmem:[%s1408_s0 + $0xb0] sm:$0xff]  ;;  %v1011_v38 = vld [vmem:[%s1408_s0 + $0xf8] sm:$0xff]  ;;  %v1228_v39 = vld [vmem:[%s1410_s2] ss:$0 sm:$0xff] }
  0x12   :  { %916 = vmatmul.msk.bf16.vlgmr.msra.gmra.mxu0 %vm270_vm1, %v980_v6  ;;  %930 = vmatmul.msk.bf16.vlgmr.msra.gmra.mxu2 %vm270_vm1, %v994_v7 }
  0x13   :  { %939 = vmatmul.msk.bf16.vlgmr.msra.gmra.mxu3 %vm270_vm1, %v1003_v8  ;;  %925 = vmatmul.msk.bf16.vlgmr.msra.gmra.mxu1 %vm270_vm1, %v989_v18 }
  0x22   :  { %917 = vmatmul.msk.bf16.gmra.mxu0 %vm270_vm1, %v981_v9  ;;  %931 = vmatmul.msk.bf16.gmra.mxu2 %vm270_vm1, %v995_v10 }
  0x23   :  { %940 = vmatmul.msk.bf16.gmra.mxu3 %vm270_vm1, %v1004_v11  ;;  %926 = vmatmul.msk.bf16.gmra.mxu1 %vm270_vm1, %v990_v22 }
  0x32   :  { %918 = vmatmul.msk.bf16.gmra.mxu0 %vm270_vm1, %v982_v12  ;;  %932 = vmatmul.msk.bf16.gmra.mxu2 %vm270_vm1, %v996_v13 }
  0x33   :  { %941 = vmatmul.msk.bf16.gmra.mxu3 %vm270_vm1, %v1005_v14  ;;  %927 = vmatmul.msk.bf16.gmra.mxu1 %vm270_vm1, %v991_v26 }
  0x42   :  { %919 = vmatmul.msk.bf16.gmra.mxu0 %vm270_vm1, %v983_v15  ;;  %933 = vmatmul.msk.bf16.gmra.mxu2 %vm270_vm1, %v997_v16 }
  0x43   :  { %942 = vmatmul.msk.bf16.gmra.mxu3 %vm270_vm1, %v1006_v17  ;;  %928 = vmatmul.msk.bf16.gmra.mxu1 %vm270_vm1, %v992_v30 }
  0x52   :  { %920 = vmatmul.msk.bf16.gmra.mxu0 %vm270_vm1, %v984_v19  ;;  %934 = vmatmul.msk.bf16.gmra.mxu2 %vm270_vm1, %v998_v20 }
  0x53   :  { %943 = vmatmul.msk.bf16.gmra.mxu3 %vm270_vm1, %v1007_v21  ;;  %929 = vmatmul.msk.bf16.gmra.mxu1 %vm270_vm1, %v993_v34 }
  0x62   :  { %921 = vmatmul.msk.bf16.gmra.mxu0 %vm270_vm1, %v985_v23  ;;  %935 = vmatmul.msk.bf16.gmra.mxu2 %vm270_vm1, %v999_v24 }
  0x63   :  { %944 = vmatmul.msk.bf16.gmra.mxu3 %vm270_vm1, %v1008_v25 }
  0x72   :  { %922 = vmatmul.msk.bf16.gmra.mxu0 %vm270_vm1, %v986_v27  ;;  %936 = vmatmul.msk.bf16.gmra.mxu2 %vm270_vm1, %v1000_v28 }
  0x73   :  { %945 = vmatmul.msk.bf16.gmra.mxu3 %vm270_vm1, %v1009_v29 }
  0x82   :  { %923 = vmatmul.msk.bf16.gmra.mxu0 %vm270_vm1, %v987_v31  ;;  %937 = vmatmul.msk.bf16.gmra.mxu2 %vm270_vm1, %v1001_v32 }
  0x83   :  { %946 = vmatmul.msk.bf16.gmra.mxu3 %vm270_vm1, %v1010_v33 }
  0x8f   :  { %v380_v37 = vpop.f32.mrf.mxu0 }
  0x90   :  { %v381_v40 = vadd.f32 %v1228_v39, %v380_v37  ;;  %v1263_v24 = vpop.f32.mrf.mxu1 }
  0x92   :  { %924 = vmatmul.msk.bf16.gmra.mxu0 %vm270_vm1, %v988_v35  ;;  %938 = vmatmul.msk.bf16.gmra.mxu2 %vm270_vm1, %v1002_v36  ;;  %v540_v44 = vmax.f32 %v381_v40, 0.0  ;;  %v1021_v40 = vld [vmem:[%s1411_s3 + $0x38] sm:$0xff] }
  0x93   :  { %947 = vmatmul.msk.bf16.gmra.mxu3 %vm270_vm1, %v1011_v38  ;;  %750 = vmatpush.bf16.msrb.mxu1 %v1021_v40 }
  0x95   :  { %v1234_v41 = vpop.f32.mrf.mxu2 }
  0x96   :  { %v1236_v42 = vpop.f32.mrf.mxu3 }
  0x97   :  { %v382_v43 = vpop.f32.mrf.mxu0 }
  0x98   :  { %v383_v45 = vadd.f32 %v1228_v39, %v382_v43  ;;  %v1267_v29 = vpop.f32.mrf.mxu1 }
  0x9a   :  { %v541_v46 = vmax.f32 %v383_v45, 0.0 }
  0x9c   :  { %v604_v47 = vadd.f32 %v541_v46, %v540_v44 }
  0x9d   :  { %v1239_v48 = vpop.f32.mrf.mxu2 }
  0x9e   :  { %v1241_v49 = vpop.f32.mrf.mxu3 }
  0x9f   :  { %v385_v50 = vpop.f32.mrf.mxu0 }
  0xa0   :  { %v386_v51 = vadd.f32 %v1228_v39, %v385_v50  ;;  %v1271_v34 = vpop.f32.mrf.mxu1 }
  0xa2   :  { %v542_v52 = vmax.f32 %v386_v51, 0.0 }
  0xa4   :  { %v605_v53 = vadd.f32 %v604_v47, %v542_v52  ;;  %v1020_v47 = vld [vmem:[%s1411_s3 + $0x30] sm:$0xff] }
  0xa5   :  { %v1244_v54 = vpop.f32.mrf.mxu2  ;;  %751 = vmatpush.bf16.msrb.mxu1 %v1020_v47 }
  0xa6   :  { %v1246_v56 = vpop.f32.mrf.mxu3 }
  0xa7   :  { %v387_v55 = vpop.f32.mrf.mxu0 }
  0xa8   :  { %v388_v57 = vadd.f32 %v1228_v39, %v387_v55  ;;  %v1275_v38 = vpop.f32.mrf.mxu1 }
  0xaa   :  { %v543_v58 = vmax.f32 %v388_v57, 0.0 }
  0xac   :  { %v606_v59 = vadd.f32 %v605_v53, %v543_v58 }
  0xad   :  { %v1249_v60 = vpop.f32.mrf.mxu2 }
  0xae   :  { %v1252_v63 = vpop.f32.mrf.mxu3 }
  0xaf   :  { %v390_v61 = vpop.f32.mrf.mxu0 }
  0xb0   :  { %v391_v62 = vadd.f32 %v1228_v39, %v390_v61  ;;  %v1282_v46 = vpop.f32.mrf.mxu1 }
  0xb2   :  { %v544_v0 = vmax.f32 %v391_v62, 0.0 }
  0xb4   :  { %v607_v1 = vadd.f32 %v606_v59, %v544_v0 }
  0xb5   :  { %v460_v2 = vpop.f32.mrf.mxu2 }
  0xb6   :  { %v1255_v6 = vpop.f32.mrf.mxu3  ;;  %v461_v7 = vadd.f32 %v1228_v39, %v460_v2 }
  0xb7   :  { %v392_v3 = vpop.f32.mrf.mxu0 }
  0xb8   :  { %v393_v4 = vadd.f32 %v1228_v39, %v392_v3  ;;  %v572_v12 = vmax.f32 %v461_v7, 0.0  ;;  %v1289_v55 = vpop.f32.mrf.mxu1 }
  0xba   :  { %v545_v5 = vmax.f32 %v393_v4, 0.0 }
  0xbc   :  { %v608_v8 = vadd.f32 %v607_v1, %v545_v5 }
  0xbd   :  { %v462_v9 = vpop.f32.mrf.mxu2 }
  0xbe   :  { %v463_v10 = vadd.f32 %v1228_v39, %v462_v9  ;;  %v1260_v19 = vpop.f32.mrf.mxu3 }
  0xbf   :  { %v395_v11 = vpop.f32.mrf.mxu0 }
  0xc0   :  { %v573_v13 = vmax.f32 %v463_v10, 0.0  ;;  %v396_v14 = vadd.f32 %v1228_v39, %v395_v11 }
  0xc2   :  { %v641_v15 = vadd.f32 %v573_v13, %v572_v12  ;;  %v546_v16 = vmax.f32 %v396_v14, 0.0 }
  0xc4   :  { %v609_v17 = vadd.f32 %v608_v8, %v546_v16  ;;  %v1299_v8 = vpop.f32.mrf.mxu1 }
  0xc5   :  { %v465_v18 = vpop.f32.mrf.mxu2 }
  0xc6   :  { %v466_v20 = vadd.f32 %v1228_v39, %v465_v18  ;;  %v1265_v27 = vpop.f32.mrf.mxu3 }
  0xc7   :  { %v397_v21 = vpop.f32.mrf.mxu0 }
  0xc8   :  { %v574_v22 = vmax.f32 %v466_v20, 0.0  ;;  %v398_v58 = vadd.f32 %v1228_v39, %v397_v21 }
  0xca   :  { %v642_v23 = vadd.f32 %v641_v15, %v574_v22  ;;  %v547_v62 = vmax.f32 %v398_v58, 0.0 }
  0xcc   :  { %v610_v9 = vadd.f32 %v609_v17, %v547_v62 }
  0xcd   :  { %v467_v25 = vpop.f32.mrf.mxu2 }
  0xce   :  { %v1269_v31 = vpop.f32.mrf.mxu3  ;;  %v468_v1 = vadd.f32 %v1228_v39, %v467_v25 }
  0xcf   :  { %v400_v26 = vpop.f32.mrf.mxu0 }
  0xd0   :  { %v401_v61 = vadd.f32 %v1228_v39, %v400_v26  ;;  %v575_v12 = vmax.f32 %v468_v1, 0.0  ;;  %v1315_v1 = vpop.f32.mrf.mxu1 }
  0xd2   :  { %v548_v3 = vmax.f32 %v401_v61, 0.0  ;;  %v643_v17 = vadd.f32 %v642_v23, %v575_v12  ;;  %v1019_v23 = vld [vmem:[%s1411_s3 + $0x28] sm:$0xff] }
  0xd3   :  { %752 = vmatpush.bf16.msrb.mxu1 %v1019_v23 }
  0xd4   :  { %v611_v14 = vadd.f32 %v610_v9, %v548_v3 }
  0xd5   :  { %v470_v28 = vpop.f32.mrf.mxu2 }
  0xd6   :  { %v1273_v35 = vpop.f32.mrf.mxu3  ;;  %v471_v5 = vadd.f32 %v1228_v39, %v470_v28 }
  0xd7   :  { %v402_v30 = vpop.f32.mrf.mxu0 }
  0xd8   :  { %v403_v0 = vadd.f32 %v1228_v39, %v402_v30  ;;  %v576_v18 = vmax.f32 %v471_v5, 0.0 }
  0xda   :  { %v549_v10 = vmax.f32 %v403_v0, 0.0  ;;  %v644_v47 = vadd.f32 %v643_v17, %v576_v18 }
  0xdc   :  { %v612_v22 = vadd.f32 %v611_v14, %v549_v10 }
  0xdd   :  { %v472_v32 = vpop.f32.mrf.mxu2 }
  0xde   :  { %v1280_v44 = vpop.f32.mrf.mxu3  ;;  %v473_v13 = vadd.f32 %v1228_v39, %v472_v32 }
  0xdf   :  { %v405_v33 = vpop.f32.mrf.mxu0 }
  0xe0   :  { %v406_v4 = vadd.f32 %v1228_v39, %v405_v33  ;;  %v577_v28 = vmax.f32 %v473_v13, 0.0 }
  0xe2   :  { %v550_v15 = vmax.f32 %v406_v4, 0.0 }
  0xe5   :  { %v475_v36 = vpop.f32.mrf.mxu2 }
  0xe6   :  { %v1287_v52 = vpop.f32.mrf.mxu3  ;;  %v476_v20 = vadd.f32 %v1228_v39, %v475_v36 }
  0xe7   :  { %v407_v37 = vpop.f32.mrf.mxu0 }
  0xe8   :  { %v408_v11 = vadd.f32 %v1228_v39, %v407_v37  ;;  %v613_v37 = vadd.f32 %v612_v22, %v550_v15 }
  0xea   :  { %v551_v25 = vmax.f32 %v408_v11, 0.0 }
  0xec   :  { %v614_v61 = vadd.f32 %v613_v37, %v551_v25 }
  0xed   :  { %v477_v43 = vpop.f32.mrf.mxu2 }
  0xee   :  { %v1292_v59 = vpop.f32.mrf.mxu3  ;;  %v478_v30 = vadd.f32 %v1228_v39, %v477_v43 }
  0xef   :  { %v410_v45 = vpop.f32.mrf.mxu0 }
  0xf0   :  { %v411_v16 = vadd.f32 %v1228_v39, %v410_v45  ;;  %v578_v45 = vmax.f32 %v476_v20, 0.0  ;;  %v579_v43 = vmax.f32 %v478_v30, 0.0  ;;  %v428_v30 = vadd.f32 %v1228_v39, %v1267_v29 }
  0xf1   :  { %v433_v29 = vadd.f32 %v1228_v39, %v1275_v38  ;;  %v1018_v38 = vld [vmem:[%s1411_s3 + $0x20] sm:$0xff] }
  0xf2   :  { %v552_v32 = vmax.f32 %v411_v16, 0.0  ;;  %753 = vmatpush.bf16.msrb.mxu1 %v1018_v38 }
  0xf4   :  { %v615_v3 = vadd.f32 %v614_v61, %v552_v32 }
  0xf5   :  { %v480_v50 = vpop.f32.mrf.mxu2 }
  0xf6   :  { %v1305_v21 = vpop.f32.mrf.mxu3  ;;  %v481_v58 = vadd.f32 %v1228_v39, %v480_v50 }
  0xf7   :  { %v412_v51 = vpop.f32.mrf.mxu0 }
  0xf8   :  { %v413_v26 = vadd.f32 %v1228_v39, %v412_v51  ;;  %v645_v51 = vadd.f32 %v644_v47, %v577_v28  ;;  %v580_v9 = vmax.f32 %v481_v58, 0.0 }
  0xfa   :  { %v553_v62 = vmax.f32 %v413_v26, 0.0  ;;  %v646_v50 = vadd.f32 %v645_v51, %v578_v45  ;;  %v445_v45 = vpop.f32.mrf.mxu1 }
  0xfc   :  { %v616_v10 = vadd.f32 %v615_v3, %v553_v62  ;;  %v647_v12 = vadd.f32 %v646_v50, %v579_v43  ;;  %v496_v62 = vadd.f32 %v1228_v39, %v1236_v42 }
  0xfd   :  { %v482_v53 = vpop.f32.mrf.mxu2 }
  0xfe   :  { %v1320_v14 = vpop.f32.mrf.mxu3  ;;  %v648_v22 = vadd.f32 %v647_v12, %v580_v9 }
  0xff   :  { %v415_v57 = vpop.f32.mrf.mxu0 }
 0x100   :  { %v416_v40 = vadd.f32 %v1228_v39, %v415_v57  ;;  %v483_v57 = vadd.f32 %v1228_v39, %v482_v53  ;;  %v426_v53 = vadd.f32 %v1228_v39, %v1263_v24 }
 0x102   :  { %v554_v4 = vmax.f32 %v416_v40, 0.0  ;;  %v581_v15 = vmax.f32 %v483_v57, 0.0  ;;  %v558_v24 = vmax.f32 %v426_v53, 0.0 }
 0x104   :  { %v617_v16 = vadd.f32 %v616_v10, %v554_v4  ;;  %v649_v37 = vadd.f32 %v648_v22, %v581_v15  ;;  %v501_v10 = vadd.f32 %v1228_v39, %v1246_v56  ;;  %v1017_v56 = vld [vmem:[%s1411_s3 + $0x18] sm:$0xff]  ;;  %v506_v22 = vadd.f32 %v1228_v39, %v1255_v6 }
 0x105   :  { %v485_v2 = vpop.f32.mrf.mxu2  ;;  %754 = vmatpush.bf16.msrb.mxu1 %v1017_v56 }
 0x106   :  { %v1338_v4 = vpop.f32.mrf.mxu3  ;;  %v590_v6 = vmax.f32 %v506_v22, 0.0 }
 0x107   :  { %v417_v7 = vpop.f32.mrf.mxu0 }
 0x108   :  { %v418_v0 = vadd.f32 %v1228_v39, %v417_v7  ;;  %v486_v7 = vadd.f32 %v1228_v39, %v485_v2 }
 0x10a   :  { %v555_v11 = vmax.f32 %v418_v0, 0.0  ;;  %v582_v26 = vmax.f32 %v486_v7, 0.0  ;;  %v559_v0 = vmax.f32 %v428_v30, 0.0  ;;  %v438_v7 = vadd.f32 %v1228_v39, %v1289_v55 }
 0x10b   :  { %v588_v55 = vmax.f32 %v501_v10, 0.0  ;;  %v508_v30 = vadd.f32 %v1228_v39, %v1260_v19  ;;  %v513_v19 = vadd.f32 %v1228_v39, %v1269_v31  ;;  %v456_v31 = vadd.f32 %v1228_v39, %v1244_v54 }
 0x10c   :  { %v618_v17 = vadd.f32 %v617_v16, %v555_v11  ;;  %v650_v58 = vadd.f32 %v649_v37, %v582_v26  ;;  %v561_v11 = vmax.f32 %v433_v29, 0.0  ;;  %v447_v26 = vpop.f32.mrf.mxu1 }
 0x10d   :  { %v487_v33 = vpop.f32.mrf.mxu2 }
 0x10e   :  { %v488_v18 = vadd.f32 %v1228_v39, %v487_v33  ;;  %v431_v33 = vadd.f32 %v1228_v39, %v1271_v34  ;;  %v498_v34 = vadd.f32 %v1228_v39, %v1241_v49  ;;  %v586_v49 = vmax.f32 %v496_v62, 0.0 }
 0x10f   :  { %v420_v36 = vpop.f32.mrf.mxu0  ;;  %v591_v62 = vmax.f32 %v508_v30, 0.0 }
 0x110   :  { %v421_v5 = vadd.f32 %v1228_v39, %v420_v36  ;;  %v583_v32 = vmax.f32 %v488_v18, 0.0  ;;  %v560_v57 = vmax.f32 %v431_v33, 0.0  ;;  %v587_v15 = vmax.f32 %v498_v34, 0.0 }
 0x111   :  { %v441_v18 = vadd.f32 %v1228_v39, %v1299_v8  ;;  %v511_v33 = vadd.f32 %v1228_v39, %v1265_v27  ;;  %v453_v27 = vadd.f32 %v1228_v39, %v1239_v48  ;;  %v1015_v48 = vld [vmem:[%s1411_s3 + $0x8] sm:$0xff] }
 0x112   :  { %v556_v20 = vmax.f32 %v421_v5, 0.0  ;;  %v651_v51 = vadd.f32 %v650_v58, %v583_v32  ;;  %v436_v5 = vadd.f32 %v1228_v39, %v1282_v46  ;;  %v503_v46 = vadd.f32 %v1228_v39, %v1252_v63 }
 0x113   :  { %v564_v37 = vmax.f32 %v441_v18, 0.0  ;;  %v569_v38 = vmax.f32 %v453_v27, 0.0 }
 0x114   :  { %v619_v40 = vadd.f32 %v618_v17, %v556_v20  ;;  %v562_v16 = vmax.f32 %v436_v5, 0.0  ;;  %v443_v17 = vadd.f32 %v1228_v39, %v1315_v1  ;;  %v589_v8 = vmax.f32 %v503_v46, 0.0 }
 0x115   :  { %v490_v13 = vpop.f32.mrf.mxu2  ;;  %v593_v5 = vmax.f32 %v513_v19, 0.0 }
 0x116   :  { %v491_v28 = vadd.f32 %v1228_v39, %v490_v13  ;;  %v565_v1 = vmax.f32 %v443_v17, 0.0 }
 0x117   :  { %v422_v25 = vpop.f32.mrf.mxu0 }
 0x118   :  { %v423_v2 = vadd.f32 %v1228_v39, %v422_v25  ;;  %v584_v36 = vmax.f32 %v491_v28, 0.0  ;;  %v563_v25 = vmax.f32 %v438_v7, 0.0  ;;  %v521_v7 = vadd.f32 %v1228_v39, %v1287_v52 }
 0x119   :  { %v526_v52 = vadd.f32 %v1228_v39, %v1305_v21 }
 0x11a   :  { %v557_v47 = vmax.f32 %v423_v2, 0.0  ;;  %v652_v50 = vadd.f32 %v651_v51, %v584_v36  ;;  %v446_v2 = vadd.f32 %v1228_v39, %v445_v45  ;;  %v451_v45 = vadd.f32 %v1228_v39, %v1234_v41  ;;  %v1016_v51 = vld [vmem:[%s1411_s3 + $0x10] sm:$0xff] }
 0x11b   :  { %755 = vmatpush.bf16.msrb.mxu1 %v1016_v51  ;;  %v596_v18 = vmax.f32 %v521_v7, 0.0 }
 0x11c   :  { %v620_v61 = vadd.f32 %v619_v40, %v557_v47  ;;  %v448_v47 = vadd.f32 %v1228_v39, %v447_v26  ;;  %v598_v26 = vmax.f32 %v526_v52, 0.0 }
 0x11d   :  { %v492_v23 = vpop.f32.mrf.mxu2 }
 0x11e   :  { %v621_v43 = vadd.f32 %v620_v61, %v558_v24  ;;  %v493_v3 = vadd.f32 %v1228_v39, %v492_v23  ;;  %v532_v24 = vpop.f32.mrf.mxu3  ;;  %v566_v61 = vmax.f32 %v446_v2, 0.0  ;;  %v567_v29 = vmax.f32 %v448_v47, 0.0 }
 0x11f   :  { %756 = vmatpush.bf16.msrb.mxu1 %v1015_v48  ;;  %v533_v2 = vadd.f32 %v1228_v39, %v532_v24 }
 0x120   :  { %v622_v42 = vadd.f32 %v621_v43, %v559_v0  ;;  %v585_v9 = vmax.f32 %v493_v3, 0.0  ;;  %v592_v43 = vmax.f32 %v511_v33, 0.0  ;;  %v516_v3 = vadd.f32 %v1228_v39, %v1273_v35 }
 0x121   :  { %v458_v35 = vadd.f32 %v1228_v39, %v1249_v60  ;;  %v601_v47 = vmax.f32 %v533_v2, 0.0 }
 0x122   :  { %v623_v12 = vadd.f32 %v622_v42, %v560_v57  ;;  %v653_v13 = vadd.f32 %v652_v50, %v585_v9  ;;  %v568_v57 = vmax.f32 %v451_v45, 0.0  ;;  %v518_v50 = vadd.f32 %v1228_v39, %v1280_v44  ;;  %v1014_v44 = vld [vmem:[%s1411_s3] sm:$0xff] }
 0x123   :  { %v594_v10 = vmax.f32 %v516_v3, 0.0  ;;  %v571_v60 = vmax.f32 %v458_v35, 0.0  ;;  %757 = vmatpush.bf16.msrb.mxu1 %v1014_v44 }
 0x124   :  { %v624_v20 = vadd.f32 %v623_v12, %v561_v11  ;;  %v654_v53 = vadd.f32 %v653_v13, %v586_v49  ;;  %v570_v11 = vmax.f32 %v456_v31, 0.0  ;;  %v595_v13 = vmax.f32 %v518_v50, 0.0 }
 0x126   :  { %v625_v63 = vadd.f32 %v624_v20, %v562_v16  ;;  %v655_v28 = vadd.f32 %v654_v53, %v587_v15  ;;  %v535_v12 = vpop.f32.mrf.mxu3  ;;  %v523_v15 = vadd.f32 %v1228_v39, %v1292_v59  ;;  %v531_v59 = vadd.f32 %v1228_v39, %v1338_v4 }
 0x128   :  { %v626_v32 = vadd.f32 %v625_v63, %v563_v25  ;;  %v656_v40 = vadd.f32 %v655_v28, %v588_v55  ;;  %v597_v56 = vmax.f32 %v523_v15, 0.0  ;;  %v528_v55 = vadd.f32 %v1228_v39, %v1320_v14 }
 0x129   :  { %v600_v21 = vmax.f32 %v531_v59, 0.0 }
 0x12a   :  { %v627_v58 = vadd.f32 %v626_v32, %v564_v37  ;;  %v657_v36 = vadd.f32 %v656_v40, %v589_v8  ;;  %v599_v63 = vmax.f32 %v528_v55, 0.0  ;;  %v536_v32 = vadd.f32 %v1228_v39, %v535_v12 }
 0x12c   :  { %v628_v0 = vadd.f32 %v627_v58, %v565_v1  ;;  %v658_v23 = vadd.f32 %v657_v36, %v590_v6  ;;  %v602_v1 = vmax.f32 %v536_v32, 0.0 }
 0x12e   :  { %v659_v34 = vadd.f32 %v658_v23, %v591_v62  ;;  %v629_v41 = vadd.f32 %v628_v0, %v566_v61  ;;  %v537_v8 = vpop.f32.mrf.mxu3 }
 0x12f   :  { %v538_v14 = vadd.f32 %v1228_v39, %v537_v8 }
 0x130   :  { %v660_v42 = vadd.f32 %v659_v34, %v592_v43  ;;  %v630_v9 = vadd.f32 %v629_v41, %v567_v29  ;;  %v1033_v34 = vld [vmem:[%s1412_s4] ss:$0 sm:$0xff] }
 0x131   :  { %v603_v4 = vmax.f32 %v538_v14, 0.0 }
 0x132   :  { %v661_v49 = vadd.f32 %v660_v42, %v593_v5  ;;  %v631_v54 = vadd.f32 %v630_v9, %v568_v57 }
 0x134   :  { %v662_v46 = vadd.f32 %v661_v49, %v594_v10  ;;  %v632_v16 = vadd.f32 %v631_v54, %v569_v38 }
 0x136   :  { %v663_v20 = vadd.f32 %v662_v46, %v595_v13  ;;  %v633_v53 = vadd.f32 %v632_v16, %v570_v11 }
 0x138   :  { %v664_v22 = vadd.f32 %v663_v20, %v596_v18  ;;  %v634_v25 = vadd.f32 %v633_v53, %v571_v60 }
 0x13a   :  { %v665_v17 = vadd.f32 %v664_v22, %v597_v56  ;;  %v635_v37 = vrot.slane %v634_v25, 4 }
 0x13c   :  { %v666_v28 = vadd.f32 %v665_v17, %v598_v26  ;;  %v636_v33 = vadd.f32 %v635_v37, %v634_v25 }
 0x13e   :  { %v667_v30 = vadd.f32 %v666_v28, %v599_v63  ;;  %v637_v61 = vrot.slane %v636_v33, 2 }
 0x140   :  { %v668_v40 = vadd.f32 %v667_v30, %v600_v21  ;;  %v638_v24 = vadd.f32 %v637_v61, %v636_v33 }
 0x142   :  { %v669_v6 = vadd.f32 %v668_v40, %v601_v47  ;;  %v639_v23 = vrot.slane %v638_v24, 1 }
 0x144   :  { %v670_v58 = vadd.f32 %v669_v6, %v602_v1  ;;  %v640_v27 = vadd.f32 %v639_v23, %v638_v24 }
 0x146   :  { %v671_v36 = vadd.f32 %v670_v58, %v603_v4 }
 0x148   :  { %v672_v45 = vrot.slane %v671_v36, 4 }
 0x14a   :  { %v673_v62 = vadd.f32 %v672_v45, %v671_v36 }
 0x14c   :  { %v674_v19 = vrot.slane %v673_v62, 2 }
 0x14e   :  { %v675_v0 = vadd.f32 %v674_v19, %v673_v62 }
 0x150   :  { %v676_v29 = vrot.slane %v675_v0, 1 }
 0x152   :  { %v677_v51 = vadd.f32 %v676_v29, %v675_v0 }
 0x154   :  { %v679_v43 = vsel %vm678_vm2, %v640_v27, %v677_v51 }
 0x155   :  { %v680_v3 = vmul.f32 0.00390625, %v679_v43 }
 0x157   :  { %v681_v39 = vpack.c.bf16 %v680_v3, %v680_v3 }
 0x159   :  { %758 = vmatmul.bf16.vlgmr.msrb.gmra.mxu1 %v681_v39 }
 0x1d6   :  { %v759_v41 = vpop.f32.mrf.mxu1 }
 0x1d7   :  { %v760_v57 = vadd.f32 %v1033_v34, %v759_v41 }
 0x1d9   :  { %763 = vst [vmem:[#allocation2] sm:$0x3] %v760_v57 }
 0x1da   :  { %774 = dma.vmem_to_hbm [thread:$0]  %s770_s28, 32, %s772_s30, [#allocation3]  }
 0x1de   :  { %v761_v31 = vpop.f32.mrf.mxu1 }
 0x1df   :  { %1058 = dma.done.wait [#allocation3], 32  }
 0x1e0   :  { %1059 = vsyncadd [#allocation3], 4294967264 }
 0x1e1   :  { %779 = vsyncpa [#allocation3], 1 }

</bundles_post_ra>
